<compile_context>
chip_gen: v5e
topology: v5e:2x2
jax: 0.10.0
libtpu: 0.0.40
codegen_flags: <defaults>
</compile_context>

<pallas_src>
import functools

import jax
import jax.numpy as jnp
from jax import lax
from jax.experimental import pallas as pl
from jax.experimental.pallas import tpu as pltpu


def _round_up(x, m):
    return ((x + m - 1) // m) * m


# ---------------------------------------------------------------------------
# Pallas kernel: fused (im2col-tile @ W) + bias + LeakyReLU(0.2)
# ---------------------------------------------------------------------------
def _conv_mm_bias_lrelu_kernel(a_ref, w_ref, b_ref, o_ref):
    # a_ref: (TM, K)     bf16 im2col rows (tile of M)
    # w_ref: (K, Cpad)   bf16 spectrally-normalized conv weight (lane-padded Cout)
    # b_ref: (1, Cpad)   f32 bias (lane-padded)
    # o_ref: (TM, Cpad)  f32 output tile
    acc = jnp.dot(a_ref[...], w_ref[...], preferred_element_type=jnp.float32)
    acc = acc + b_ref[...]
    # LeakyReLU(0.2) without a compare: max(x, 0.2*x)
    o_ref[...] = jnp.maximum(acc, 0.2 * acc).astype(o_ref.dtype)


def _pick_tile_m(m_rows, k, cpad, vmem_budget_bytes):
    """Largest M-tile (multiple of 8, <=512) whose double-buffered footprint fits."""
    cap = min(512, _round_up(m_rows, 8))
    for t in (512, 256, 128, 64, 32, 16, 8):
        if t > cap:
            continue
        # 2x A tile (bf16) + 2x out tile (f32) + 2x resident W (bf16) + bias (f32)
        need = 2 * t * k * 2 + 2 * t * cpad * 4 + 2 * k * cpad * 2 + 2 * cpad * 4
        if need <= vmem_budget_bytes:
            return t
    return 8


def _fused_matmul_bias_lrelu(a_bf16, w_bf16, b_f32):
    M, K = a_bf16.shape
    K2, Cpad = w_bf16.shape
    assert K == K2 and Cpad % 128 == 0

    TM = _pick_tile_m(M, K, Cpad, vmem_budget_bytes=32 * 1024 * 1024)
    grid_m = pl.cdiv(M, TM)
    M_pad = grid_m * TM
    if M_pad != M:
        a_bf16 = jnp.pad(a_bf16, ((0, M_pad - M), (0, 0)))

    cost = pl.CostEstimate(
        flops=2 * M_pad * K * Cpad,
        transcendentals=0,
        bytes_accessed=(M_pad * K * 2) + (K * Cpad * 2) + (Cpad * 4) + (M_pad * Cpad * 4),
    )

    out = pl.pallas_call(
        _conv_mm_bias_lrelu_kernel,
        out_shape=jax.ShapeDtypeStruct((M_pad, Cpad), jnp.float32),
        grid=(grid_m,),
        in_specs=[
            pl.BlockSpec((TM, K), lambda i: (i, 0)),        # A tile: pipelined over M
            pl.BlockSpec((K, Cpad), lambda i: (0, 0)),      # W: VMEM-resident
            pl.BlockSpec((1, Cpad), lambda i: (0, 0)),      # bias: VMEM-resident
        ],
        out_specs=pl.BlockSpec((TM, Cpad), lambda i: (i, 0)),  # lane-dense output
        compiler_params=pltpu.CompilerParams(
            dimension_semantics=("parallel",),              # shard M tiles across TCs (v7x)
            vmem_limit_bytes=48 * 1024 * 1024,
        ),
        cost_estimate=cost,
    )(a_bf16, w_bf16, b_f32)
    return out[:M]


# ---------------------------------------------------------------------------
# Spectral norm (parameter setup, plain JAX)
# ---------------------------------------------------------------------------
def spectral_norm_weight(w, u0, eps=1e-12):
    """One power-iteration step (PyTorch nn.utils.spectral_norm, training mode)."""
    cout = w.shape[0]
    w2d = w.reshape(cout, -1)  # (Cout, Cin*KH*KW)

    def _normalize(x):
        return x / (jnp.linalg.norm(x) + eps)

    u = _normalize(u0)
    v = _normalize(w2d.T @ u)
    u = _normalize(w2d @ v)
    sigma = u @ (w2d @ v)
    return w / sigma


# ---------------------------------------------------------------------------
# D_Block forward
# ---------------------------------------------------------------------------
def d_block_forward(x_nchw, w, b, u0):
    """x_nchw: (N, Cin, H, W) -> (N, Cout, H//2, W//2)"""
    N, Cin, H, W = x_nchw.shape
    Cout, _, KH, KW = w.shape
    assert (KH, KW) == (4, 4)
    assert H % 2 == 0 and W % 2 == 0, "k=4,s=2,p=1 path assumes even spatial dims"
    Ho, Wo = H // 2, W // 2

    # --- parameter setup (spectral norm, f32) -----------------------------
    w_sn = spectral_norm_weight(w.astype(jnp.float32), u0.astype(jnp.float32))

    # --- im2col glue (bf16 to halve HBM traffic of the expanded buffer) ---
    # TODO(synk): fuse patch extraction into the kernel (manual slab DMA per (N, Ho-tile))
    #             to avoid materializing the 16x-expanded im2col buffer in HBM at all.
    x_nhwc = jnp.transpose(x_nchw, (0, 2, 3, 1)).astype(jnp.bfloat16)   # (N, H, W, Cin)
    xp = jnp.pad(x_nhwc, ((0, 0), (1, 1), (1, 1), (0, 0)))              # pad=1

    patches = []
    for kh in range(KH):
        for kw in range(KW):
            patches.append(xp[:, kh:kh + 2 * Ho:2, kw:kw + 2 * Wo:2, :])
    cols = jnp.concatenate(patches, axis=-1)                 # (N, Ho, Wo, KH*KW*Cin)
    M = N * Ho * Wo
    K = KH * KW * Cin
    a = cols.reshape(M, K)                                   # bf16

    # weight rows ordered (kh, kw, cin) to match the column order above;
    # lane-pad Cout to a multiple of 128 for dense stores / full MXU output lanes.
    Cpad = _round_up(Cout, 128)
    w_mat = jnp.transpose(w_sn, (2, 3, 1, 0)).reshape(K, Cout)
    w_mat = jnp.pad(w_mat, ((0, 0), (0, Cpad - Cout))).astype(jnp.bfloat16)
    b_mat = jnp.pad(b.astype(jnp.float32).reshape(1, Cout), ((0, 0), (0, Cpad - Cout)))

    # --- Pallas hot path ---------------------------------------------------
    out_flat = _fused_matmul_bias_lrelu(a, w_mat, b_mat)     # (M, Cpad) f32

    out = out_flat[:, :Cout].reshape(N, Ho, Wo, Cout)
    return jnp.transpose(out, (0, 3, 1, 2))                  # back to NCHW


# ---------------------------------------------------------------------------
# Reference (pure JAX, f32) for correctness check
# ---------------------------------------------------------------------------
def d_block_reference(x_nchw, w, b, u0):
    w_sn = spectral_norm_weight(w.astype(jnp.float32), u0.astype(jnp.float32))
    y = lax.conv_general_dilated(
        x_nchw.astype(jnp.float32),
        w_sn,
        window_strides=(2, 2),
        padding=((1, 1), (1, 1)),
        dimension_numbers=("NCHW", "OIHW", "NCHW"),
    )
    y = y + b.reshape(1, -1, 1, 1).astype(jnp.float32)
    return jnp.where(y > 0.0, y, 0.2 * y)


def _run_case(key, N, Cin, Cout, H, W):
    k_x, k_w, k_b, k_u = jax.random.split(key, 4)
    x = jax.random.normal(k_x, (N, Cin, H, W), dtype=jnp.float32)
    w = jax.random.normal(k_w, (Cout, Cin, 4, 4), dtype=jnp.float32) * 0.1
    b = jax.random.normal(k_b, (Cout,), dtype=jnp.float32) * 0.1
    u0 = jax.random.normal(k_u, (Cout,), dtype=jnp.float32)

    out = jax.block_until_ready(jax.jit(d_block_forward)(x, w, b, u0))
    ref = jax.block_until_ready(jax.jit(d_block_reference)(x, w, b, u0))

    assert out.shape == (N, Cout, H // 2, W // 2), out.shape
    # bf16 MXU operands with f32 accumulation -> compare against f32 reference
    # with a tolerance matching bf16 input rounding.
    assert jnp.allclose(out, ref, atol=2e-2, rtol=2e-2), float(jnp.max(jnp.abs(out - ref)))


if __name__ == "__main__":
    key = jax.random.PRNGKey(0)
    k1, k2 = jax.random.split(key)

    # Small case from the module spec (single M tile).
    _run_case(k1, N=2, Cin=4, Cout=8, H=16, W=16)
    # Slightly larger case: M = 4*16*16 = 1024 -> two 512-row tiles (exercises the
    # pipelined grid / multi-tile index maps).
    _run_case(k2, N=4, Cin=8, Cout=16, H=32, W=32)

    print("KERNEL_OK")
</pallas_src>

<mosaic_0001>
module attributes {stable_mosaic.version = 11 : i64} {
  func.func @_conv_mm_bias_lrelu_kernel(%arg0: i32, %arg1: memref<128x64xbf16, #tpu.memory_space<vmem>>, %arg2: memref<64x128xbf16, #tpu.memory_space<vmem>>, %arg3: memref<1x128xf32, #tpu.memory_space<vmem>>, %arg4: memref<128x128xf32, #tpu.memory_space<vmem>>) attributes {dimension_semantics = [#tpu.dimension_semantics<parallel>], iteration_bounds = array<i64: 1>, scalar_prefetch = 0 : i64, scratch_operands = 0 : i64, tpu.core_type = #tpu.core_type<tc>, window_params = [{transform_indices = @transform_0, window_bounds = array<i64: 128, 64>}, {pipeline_mode = #tpu.pipeline_mode<synchronous>, transform_indices = @transform_1, window_bounds = array<i64: 64, 128>}, {pipeline_mode = #tpu.pipeline_mode<synchronous>, transform_indices = @transform_2, window_bounds = array<i64: 1, 128>}, {transform_indices = @transform_3, window_bounds = array<i64: 128, 128>}]} {
    %c0 = arith.constant 0 : index
    %c0_0 = arith.constant 0 : index
    %0 = vector.load %arg1[%c0, %c0_0] : memref<128x64xbf16, #tpu.memory_space<vmem>>, vector<128x64xbf16>
    %c0_1 = arith.constant 0 : index
    %c0_2 = arith.constant 0 : index
    %1 = vector.load %arg2[%c0_1, %c0_2] : memref<64x128xbf16, #tpu.memory_space<vmem>>, vector<64x128xbf16>
    %cst = arith.constant dense<0.000000e+00> : vector<128x128xf32>
    %2 = tpu.matmul %0, %1, %cst {dimension_numbers = #tpu.dot_dimension_numbers<[1], [0], [0], [1], [0, 0, 1, 1], [], []>} : vector<128x64xbf16>, vector<64x128xbf16>, vector<128x128xf32> -> vector<128x128xf32>
    %c0_3 = arith.constant 0 : index
    %c0_4 = arith.constant 0 : index
    %3 = vector.load %arg3[%c0_3, %c0_4] : memref<1x128xf32, #tpu.memory_space<vmem>>, vector<1x128xf32>
    %4 = vector.broadcast %3 : vector<1x128xf32> to vector<128x128xf32>
    %5 = arith.addf %2, %4 : vector<128x128xf32>
    %cst_5 = arith.constant 2.000000e-01 : f32
    %6 = vector.broadcast %cst_5 : f32 to vector<128x128xf32>
    %7 = arith.mulf %6, %5 : vector<128x128xf32>
    %8 = arith.maximumf %5, %7 : vector<128x128xf32>
    %c0_6 = arith.constant 0 : index
    %c0_7 = arith.constant 0 : index
    %9 = vector.load %arg4[%c0_6, %c0_7] : memref<128x128xf32, #tpu.memory_space<vmem>>, vector<128x128xf32>
    tpu.vector_store %arg4[%c0_6, %c0_7], %8 {strides = array<i32>} : memref<128x128xf32, #tpu.memory_space<vmem>>, vector<128x128xf32>,
    return
  }
  func.func @transform_0(%arg0: i32) -> (i32, i32) {
    %c0_i32 = arith.constant 0 : i32
    %c0_i32_0 = arith.constant 0 : i32
    return %arg0, %c0_i32 : i32, i32
  }
  func.func @transform_1(%arg0: i32) -> (i32, i32) {
    %c0_i32 = arith.constant 0 : i32
    %c0_i32_0 = arith.constant 0 : i32
    %c0_i32_1 = arith.constant 0 : i32
    return %c0_i32, %c0_i32_0 : i32, i32
  }
  func.func @transform_2(%arg0: i32) -> (i32, i32) {
    %c0_i32 = arith.constant 0 : i32
    %c0_i32_0 = arith.constant 0 : i32
    %c0_i32_1 = arith.constant 0 : i32
    return %c0_i32, %c0_i32_0 : i32, i32
  }
  func.func @transform_3(%arg0: i32) -> (i32, i32) {
    %c0_i32 = arith.constant 0 : i32
    %c0_i32_0 = arith.constant 0 : i32
    return %arg0, %c0_i32 : i32, i32
  }
}

</mosaic_0001>

<bundles_post_ra>
// kernel: d_block_forward.1
= control target key start
LH: loop header
LB: loop body
LE: loop exit
PB: predicated region body
PF: predicated region fallthrough
CT: control target
= control target key end

     0   :  { %vm107_vm0 = vcmask 523264   ;;  %s447_s1 = inlined_call_operand.vmem [shape: bf16[64,128], index: 1, kind: input, shape index: {}]   ;;  %s448_s2 = inlined_call_operand.vmem [shape: f32[1,128], index: 2, kind: input, shape index: {}]   ;;  %s449_s0 = inlined_call_operand.vmem [shape: bf16[128,64], index: 0, kind: input, shape index: {}]   ;;  %s450_s3 = inlined_call_operand.vmem [shape: f32[128,128], index: 3, kind: output, shape index: {}]  }
   0x1   :  { %v300_v0 = vld [vmem:[%s447_s1 + $0x18] sm:$0xff]  ;;  %v299_v1 = vld [vmem:[%s447_s1 + $0x10] sm:$0xff]  ;;  %v298_v2 = vld [vmem:[%s447_s1 + $0x8] sm:$0xff] }
   0x2   :  { %136 = vmatpush.bf16.msra.mxu0 %v300_v0  ;;  %301 = vmatpush.bf16.msra.mxu1 %v300_v0  ;;  %v297_v3 = vld [vmem:[%s447_s1] sm:$0xff]  ;;  %v291_v5 = vld [vmem:[%s449_s0 + $0x10] sm:$0xff]  ;;  %v290_v8 = vld [vmem:[%s449_s0 + $0x8] sm:$0xff] }
   0x3   :  { %302 = vmatpush.bf16.msra.mxu2 %v300_v0  ;;  %303 = vmatpush.bf16.msra.mxu3 %v300_v0  ;;  %v289_v4 = vld [vmem:[%s449_s0] sm:$0xff]  ;;  %v295_v7 = vld [vmem:[%s449_s0 + $0x30] sm:$0xff]  ;;  %v292_v9 = vld [vmem:[%s449_s0 + $0x18] sm:$0xff] }
   0x4   :  { %v293_v6 = vld [vmem:[%s449_s0 + $0x20] sm:$0xff]  ;;  %v294_v10 = vld [vmem:[%s449_s0 + $0x28] sm:$0xff]  ;;  %v296_v11 = vld [vmem:[%s449_s0 + $0x38] sm:$0xff] }
   0x5   :  { %v381_v12 = vld [vmem:[%s448_s2] ss:$0 sm:$0xff] }
   0x6   :  { %137 = vmatpush.bf16.msra.mxu0 %v299_v1  ;;  %304 = vmatpush.bf16.msra.mxu1 %v299_v1 }
   0x7   :  { %305 = vmatpush.bf16.msra.mxu2 %v299_v1  ;;  %306 = vmatpush.bf16.msra.mxu3 %v299_v1 }
   0xa   :  { %138 = vmatpush.bf16.msra.mxu0 %v298_v2  ;;  %307 = vmatpush.bf16.msra.mxu1 %v298_v2 }
   0xb   :  { %308 = vmatpush.bf16.msra.mxu2 %v298_v2  ;;  %309 = vmatpush.bf16.msra.mxu3 %v298_v2 }
   0xe   :  { %139 = vmatpush.bf16.msra.mxu0 %v297_v3  ;;  %310 = vmatpush.bf16.msra.mxu1 %v297_v3 }
   0xf   :  { %311 = vmatpush.bf16.msra.mxu2 %v297_v3  ;;  %312 = vmatpush.bf16.msra.mxu3 %v297_v3 }
  0x11   :  { %281 = vmatmul.msk.bf16.vlgmr.msra.gmra.mxu0 %vm107_vm0, %v289_v4  ;;  %283 = vmatmul.msk.bf16.vlgmr.msra.gmra.mxu1 %vm107_vm0, %v291_v5 }
  0x12   :  { %285 = vmatmul.msk.bf16.vlgmr.msra.gmra.mxu2 %vm107_vm0, %v293_v6  ;;  %287 = vmatmul.msk.bf16.vlgmr.msra.gmra.mxu3 %vm107_vm0, %v295_v7 }
  0x21   :  { %282 = vmatmul.msk.bf16.gmra.mxu0 %vm107_vm0, %v290_v8  ;;  %284 = vmatmul.msk.bf16.gmra.mxu1 %vm107_vm0, %v292_v9 }
  0x22   :  { %286 = vmatmul.msk.bf16.gmra.mxu2 %vm107_vm0, %v294_v10  ;;  %288 = vmatmul.msk.bf16.gmra.mxu3 %vm107_vm0, %v296_v11 }
  0x8e   :  { %v141_v13 = vpop.f32.mrf.mxu0  ;;  %v151_v14 = vpop.f32.mrf.mxu1 }
  0x8f   :  { %v142_v15 = vadd.f32 %v381_v12, %v141_v13  ;;  %v152_v16 = vadd.f32 %v381_v12, %v151_v14 }
  0x91   :  { %v181_v17 = vmul.f32 0.2, %v142_v15  ;;  %v185_v18 = vmul.f32 0.2, %v152_v16 }
  0x93   :  { %v197_v19 = vmax.f32 %v142_v15, %v181_v17  ;;  %v201_v20 = vmax.f32 %v152_v16, %v185_v18 }
  0x95   :  { %213 = vst [vmem:[%s450_s3] sm:$0xff] %v197_v19  ;;  %v161_v21 = vpop.f32.mrf.mxu2  ;;  %v171_v22 = vpop.f32.mrf.mxu3 }
  0x96   :  { %217 = vst [vmem:[%s450_s3 + $0x20] sm:$0xff] %v201_v20  ;;  %v162_v23 = vadd.f32 %v381_v12, %v161_v21  ;;  %v172_v24 = vadd.f32 %v381_v12, %v171_v22  ;;  %v143_v25 = vpop.f32.mrf.mxu0  ;;  %v153_v26 = vpop.f32.mrf.mxu1 }
  0x97   :  { %v144_v27 = vadd.f32 %v381_v12, %v143_v25  ;;  %v154_v28 = vadd.f32 %v381_v12, %v153_v26 }
  0x98   :  { %v189_v29 = vmul.f32 0.2, %v162_v23  ;;  %v193_v30 = vmul.f32 0.2, %v172_v24 }
  0x99   :  { %v182_v31 = vmul.f32 0.2, %v144_v27  ;;  %v186_v32 = vmul.f32 0.2, %v154_v28 }
  0x9a   :  { %v205_v33 = vmax.f32 %v162_v23, %v189_v29  ;;  %v209_v34 = vmax.f32 %v172_v24, %v193_v30 }
  0x9b   :  { %v198_v35 = vmax.f32 %v144_v27, %v182_v31  ;;  %v202_v36 = vmax.f32 %v154_v28, %v186_v32 }
  0x9c   :  { %221 = vst [vmem:[%s450_s3 + $0x40] sm:$0xff] %v205_v33 }
  0x9d   :  { %225 = vst [vmem:[%s450_s3 + $0x60] sm:$0xff] %v209_v34  ;;  %v163_v37 = vpop.f32.mrf.mxu2  ;;  %v173_v38 = vpop.f32.mrf.mxu3 }
  0x9e   :  { %214 = vst [vmem:[%s450_s3 + $0x8] sm:$0xff] %v198_v35  ;;  %v164_v39 = vadd.f32 %v381_v12, %v163_v37  ;;  %v174_v40 = vadd.f32 %v381_v12, %v173_v38  ;;  %v146_v41 = vpop.f32.mrf.mxu0  ;;  %v156_v42 = vpop.f32.mrf.mxu1 }
  0x9f   :  { %218 = vst [vmem:[%s450_s3 + $0x28] sm:$0xff] %v202_v36  ;;  %v147_v43 = vadd.f32 %v381_v12, %v146_v41  ;;  %v157_v44 = vadd.f32 %v381_v12, %v156_v42 }
  0xa0   :  { %v190_v45 = vmul.f32 0.2, %v164_v39  ;;  %v194_v46 = vmul.f32 0.2, %v174_v40 }
  0xa1   :  { %v183_v47 = vmul.f32 0.2, %v147_v43  ;;  %v187_v48 = vmul.f32 0.2, %v157_v44 }
  0xa2   :  { %v206_v49 = vmax.f32 %v164_v39, %v190_v45  ;;  %v210_v50 = vmax.f32 %v174_v40, %v194_v46 }
  0xa3   :  { %v199_v51 = vmax.f32 %v147_v43, %v183_v47  ;;  %v203_v52 = vmax.f32 %v157_v44, %v187_v48 }
  0xa4   :  { %222 = vst [vmem:[%s450_s3 + $0x48] sm:$0xff] %v206_v49 }
  0xa5   :  { %226 = vst [vmem:[%s450_s3 + $0x68] sm:$0xff] %v210_v50  ;;  %v166_v53 = vpop.f32.mrf.mxu2  ;;  %v176_v54 = vpop.f32.mrf.mxu3 }
  0xa6   :  { %215 = vst [vmem:[%s450_s3 + $0x10] sm:$0xff] %v199_v51  ;;  %v167_v55 = vadd.f32 %v381_v12, %v166_v53  ;;  %v177_v56 = vadd.f32 %v381_v12, %v176_v54  ;;  %v148_v57 = vpop.f32.mrf.mxu0  ;;  %v158_v58 = vpop.f32.mrf.mxu1 }
  0xa7   :  { %219 = vst [vmem:[%s450_s3 + $0x30] sm:$0xff] %v203_v52  ;;  %v149_v59 = vadd.f32 %v381_v12, %v148_v57  ;;  %v159_v60 = vadd.f32 %v381_v12, %v158_v58 }
  0xa8   :  { %v191_v61 = vmul.f32 0.2, %v167_v55  ;;  %v195_v62 = vmul.f32 0.2, %v177_v56 }
  0xa9   :  { %v184_v63 = vmul.f32 0.2, %v149_v59  ;;  %v188_v0 = vmul.f32 0.2, %v159_v60 }
  0xaa   :  { %v207_v1 = vmax.f32 %v167_v55, %v191_v61  ;;  %v211_v2 = vmax.f32 %v177_v56, %v195_v62 }
  0xab   :  { %v200_v3 = vmax.f32 %v149_v59, %v184_v63  ;;  %v204_v4 = vmax.f32 %v159_v60, %v188_v0 }
  0xac   :  { %223 = vst [vmem:[%s450_s3 + $0x50] sm:$0xff] %v207_v1 }
  0xad   :  { %227 = vst [vmem:[%s450_s3 + $0x70] sm:$0xff] %v211_v2  ;;  %v168_v5 = vpop.f32.mrf.mxu2  ;;  %v178_v6 = vpop.f32.mrf.mxu3 }
  0xae   :  { %216 = vst [vmem:[%s450_s3 + $0x18] sm:$0xff] %v200_v3  ;;  %v169_v7 = vadd.f32 %v381_v12, %v168_v5  ;;  %v179_v8 = vadd.f32 %v381_v12, %v178_v6 }
  0xaf   :  { %220 = vst [vmem:[%s450_s3 + $0x38] sm:$0xff] %v204_v4 }
  0xb0   :  { %v192_v9 = vmul.f32 0.2, %v169_v7  ;;  %v196_v10 = vmul.f32 0.2, %v179_v8 }
  0xb2   :  { %v208_v11 = vmax.f32 %v169_v7, %v192_v9  ;;  %v212_v13 = vmax.f32 %v179_v8, %v196_v10 }
  0xb4   :  { %224 = vst [vmem:[%s450_s3 + $0x58] sm:$0xff] %v208_v11 }
  0xb5   :  { %228 = vst [vmem:[%s450_s3 + $0x78] sm:$0xff] %v212_v13 }

</bundles_post_ra>
